<compile_context>
chip_gen: v7x
topology: tpu7x:2x2x1
jax: 0.10.0
libtpu: 0.0.40
codegen_flags: <defaults>
</compile_context>

<pallas_src>
import math

import jax
import jax.numpy as jnp
from jax.experimental import pallas as pl
from jax.experimental.pallas import tpu as pltpu


_LANE = 128
# Working-set budget sized for v7x (64 MiB physical VMEM, 32 MiB scoped default),
# which is the tightest of v5e/v6e/v7x.  We clamp the batch tile to stay under it
# and raise the scoped limit explicitly so v5e's 16 MiB default is never binding.
_VMEM_WORKING_BUDGET = 26 * 1024 * 1024
_VMEM_LIMIT_BYTES = 32 * 1024 * 1024


def _round_up(x, m):
    return ((x + m - 1) // m) * m


def _vmem_working_bytes(tile_b, in_feat, H, Z, in_item, out_item):
    """Conservative estimate of the kernel's VMEM working set for one tile size."""
    feat_lanes = _round_up(in_feat, _LANE)   # VMEM lane-pads the minor dim to 128
    h_lanes = _round_up(H, _LANE)
    z_lanes = _round_up(Z, _LANE)
    x_bufs = 2 * tile_b * feat_lanes * in_item        # double-buffered input stream
    o_bufs = 2 * tile_b * z_lanes * out_item          # double-buffered output stream
    interm = tile_b * (h_lanes + z_lanes) * 4         # f32 h / z working values
    return x_bufs + o_bufs + interm + (1 << 20)       # + resident weights & slack


def encoder_kernel(xc_ref, w1_ref, b1_ref, w2_ref, b2_ref, out_ref):
    # Layer 1: MXU matmul on the (streamed) [x | c] tile against the resident W1.
    # Accumulate in f32; bias add + ReLU stay f32 on the VPU (v5e-safe).
    h = jnp.dot(xc_ref[...], w1_ref[...], preferred_element_type=jnp.float32)
    h = jnp.maximum(h + b1_ref[...], 0.0)
    # Layer 2: operands in the compute dtype (bf16 by default), f32 accumulation.
    z = jnp.dot(h.astype(w2_ref.dtype), w2_ref[...],
                preferred_element_type=jnp.float32)
    out_ref[...] = (z + b2_ref[...]).astype(out_ref.dtype)


def encoder_forward(x, c, w1, b1, w2, b2, *,
                    block_b=8192, hidden_pad_to=64,
                    compute_dtype=jnp.bfloat16, out_dtype=None):
    """Forward of Encoder: relu(cat([x, c], 1) @ W1 + b1) @ W2 + b2.

    x:  (B, D) float;  c: (B,) or (B, K) sensitive-attribute features
    w1: (D+K, hidden), b1: (hidden,)/(1, hidden), w2: (hidden, Z), b2: (Z,)/(1, Z)
    (weights transposed vs. PyTorch so the kernel computes row-major x @ W)
    """
    x = jnp.asarray(x)
    c = jnp.asarray(c)
    if c.ndim == 1:
        c = c[:, None]
    B, D = x.shape
    in_feat, hidden = w1.shape
    Z = w2.shape[1]
    assert c.shape[0] == B and D + c.shape[1] == in_feat, "feature dims mismatch"

    compute_dtype = jnp.dtype(compute_dtype)
    out_dtype = jnp.dtype(compute_dtype if out_dtype is None else out_dtype)
    in_item = compute_dtype.itemsize
    out_item = out_dtype.itemsize

    # ---- weights: pad only the hidden (contraction) dim 50 -> 64.  This never
    # touches HBM-streamed data; D and Z stay unpadded in HBM.
    H = max(hidden_pad_to, _round_up(hidden, 8))
    ph = H - hidden
    b1 = jnp.reshape(b1, (1, hidden)).astype(jnp.float32)
    b2 = jnp.reshape(b2, (1, Z)).astype(jnp.float32)
    w1 = jnp.asarray(w1, jnp.float32)
    w2 = jnp.asarray(w2, jnp.float32)
    if ph:
        w1 = jnp.pad(w1, ((0, 0), (0, ph)))
        b1 = jnp.pad(b1, ((0, 0), (0, ph)))
        w2 = jnp.pad(w2, ((0, ph), (0, 0)))
    w1 = w1.astype(compute_dtype)
    w2 = w2.astype(compute_dtype)

    # ---- batch tiling: big tiles to amortize per-step overhead, sublane multiple
    # of 16 for bf16 (8 for f32), >=2 grid steps when possible (v7x megacore),
    # clamped against the v7x VMEM budget.
    mult = 16 if in_item == 2 else 8
    tile_b = min(block_b, _round_up(B, mult))
    if _round_up(B, tile_b) // tile_b < 2 and B > mult:
        tile_b = min(tile_b, max(mult, _round_up((B + 1) // 2, mult)))
    while (tile_b > mult and
           _vmem_working_bytes(tile_b, in_feat, H, Z, in_item, out_item)
           > _VMEM_WORKING_BUDGET):
        tile_b = max(mult, _round_up(tile_b // 2, mult))
    B_pad = _round_up(B, tile_b)
    n_tiles = B_pad // tile_b

    # ---- build the single lane-dense streamed operand.  One fused XLA pass does
    # pad + concat (the module's torch.cat) + cast to the compute dtype, so the c
    # column rides x's contiguous DMA instead of its own (tile_b, 1) lane-sparse
    # stream, and the kernel needs no in-kernel relayout or rank-1 update.
    xc = jnp.concatenate([x.astype(jnp.float32), c.astype(jnp.float32)], axis=1)
    if B_pad != B:
        xc = jnp.pad(xc, ((0, B_pad - B), (0, 0)))
    xc = xc.astype(compute_dtype)

    cost = pl.CostEstimate(
        flops=2 * B_pad * (in_feat * H + H * Z),
        transcendentals=0,
        bytes_accessed=(B_pad * in_feat * in_item                     # xc stream
                        + (in_feat * H + H * Z) * in_item + (H + Z) * 4  # weights
                        + B_pad * Z * out_item),                       # output
    )

    out = pl.pallas_call(
        encoder_kernel,
        out_shape=jax.ShapeDtypeStruct((B_pad, Z), out_dtype),
        grid=(n_tiles,),
        in_specs=[
            pl.BlockSpec((tile_b, in_feat), lambda i: (i, 0)),   # [x|c] streamed tiles
            pl.BlockSpec((in_feat, H), lambda i: (0, 0)),        # W1  (VMEM resident)
            pl.BlockSpec((1, H), lambda i: (0, 0)),              # b1  (VMEM resident)
            pl.BlockSpec((H, Z), lambda i: (0, 0)),              # W2  (VMEM resident)
            pl.BlockSpec((1, Z), lambda i: (0, 0)),              # b2  (VMEM resident)
        ],
        out_specs=pl.BlockSpec((tile_b, Z), lambda i: (i, 0)),
        compiler_params=pltpu.CompilerParams(
            dimension_semantics=("parallel",),        # megacore sharding on v7x
            vmem_limit_bytes=_VMEM_LIMIT_BYTES),
        cost_estimate=cost,
    )(xc, w1, b1, w2, b2)

    return out[:B]


def init_encoder_params(key, input_dim, z_size, c_size, c_type="binary"):
    """Deterministic synthetic init mirroring nn.Linear default U(-k, k)."""
    if c_type == "binary":
        in_feat = input_dim + math.ceil(math.log(c_size))
    elif c_type == "one_hot":
        in_feat = input_dim + c_size
    else:
        raise ValueError(c_type)
    hidden = 50

    k1, k2, k3, k4 = jax.random.split(key, 4)
    bound1 = 1.0 / math.sqrt(in_feat)
    bound2 = 1.0 / math.sqrt(hidden)
    # Stored transposed vs. PyTorch (in, out) so the kernel does x @ W.
    w1 = jax.random.uniform(k1, (in_feat, hidden), jnp.float32, -bound1, bound1)
    b1 = jax.random.uniform(k2, (1, hidden), jnp.float32, -bound1, bound1)
    w2 = jax.random.uniform(k3, (hidden, z_size), jnp.float32, -bound2, bound2)
    b2 = jax.random.uniform(k4, (1, z_size), jnp.float32, -bound2, bound2)
    return w1, b1, w2, b2, in_feat


if __name__ == "__main__":
    key = jax.random.PRNGKey(0)
    kx, kc, kp = jax.random.split(key, 3)

    batch = 50          # not a tile multiple -> exercises padding + a 2-step grid
    input_dim = 32      # input_size[0]
    z_size = 16
    c_size = 2          # binary sensitive attribute -> +1 feature column

    w1, b1, w2, b2, in_feat = init_encoder_params(kp, input_dim, z_size, c_size,
                                                  "binary")
    assert in_feat == input_dim + 1

    x = jax.random.normal(kx, (batch, input_dim), jnp.float32)
    c = jax.random.bernoulli(kc, 0.5, (batch,)).astype(jnp.int32)

    # Pure-JAX reference of the original module's math (f32).
    xc_ref = jnp.concatenate([x, c.reshape(-1, 1).astype(jnp.float32)], axis=1)
    z_ref = jnp.maximum(xc_ref @ w1 + b1, 0.0) @ w2 + b2

    # Default path: bf16 matmul operands + bf16 output (fastest on v5e/v6e/v7x).
    z_bf16 = encoder_forward(x, c, w1, b1, w2, b2)
    jax.block_until_ready(z_bf16)
    assert z_bf16.shape == (batch, z_size)
    assert jnp.allclose(z_bf16.astype(jnp.float32), z_ref, atol=5e-2, rtol=5e-2)

    # Reference-accuracy f32 path.
    z_f32 = encoder_forward(x, c, w1, b1, w2, b2,
                            compute_dtype=jnp.float32, out_dtype=jnp.float32)
    jax.block_until_ready(z_f32)
    assert z_f32.shape == (batch, z_size)
    assert jnp.allclose(z_f32, z_ref, atol=1e-4, rtol=1e-4)

    print("KERNEL_OK")
</pallas_src>

<mosaic_0001>
module attributes {stable_mosaic.version = 11 : i64} {
  func.func @encoder_kernel(%arg0: i32, %arg1: memref<32x33xbf16, #tpu.memory_space<vmem>>, %arg2: memref<33x64xbf16, #tpu.memory_space<vmem>>, %arg3: memref<1x64xf32, #tpu.memory_space<vmem>>, %arg4: memref<64x16xbf16, #tpu.memory_space<vmem>>, %arg5: memref<1x16xf32, #tpu.memory_space<vmem>>, %arg6: memref<32x16xbf16, #tpu.memory_space<vmem>>) attributes {dimension_semantics = [#tpu.dimension_semantics<parallel>], iteration_bounds = array<i64: 2>, scalar_prefetch = 0 : i64, scratch_operands = 0 : i64, tpu.core_type = #tpu.core_type<tc>, window_params = [{transform_indices = @transform_0, window_bounds = array<i64: 32, 33>}, {pipeline_mode = #tpu.pipeline_mode<synchronous>, transform_indices = @transform_1, window_bounds = array<i64: 33, 64>}, {pipeline_mode = #tpu.pipeline_mode<synchronous>, transform_indices = @transform_2, window_bounds = array<i64: 1, 64>}, {pipeline_mode = #tpu.pipeline_mode<synchronous>, transform_indices = @transform_3, window_bounds = array<i64: 64, 16>}, {pipeline_mode = #tpu.pipeline_mode<synchronous>, transform_indices = @transform_4, window_bounds = array<i64: 1, 16>}, {transform_indices = @transform_5, window_bounds = array<i64: 32, 16>}]} {
    %c0 = arith.constant 0 : index
    %c0_0 = arith.constant 0 : index
    %0 = vector.load %arg1[%c0, %c0_0] : memref<32x33xbf16, #tpu.memory_space<vmem>>, vector<32x33xbf16>
    %c0_1 = arith.constant 0 : index
    %c0_2 = arith.constant 0 : index
    %1 = vector.load %arg2[%c0_1, %c0_2] : memref<33x64xbf16, #tpu.memory_space<vmem>>, vector<33x64xbf16>
    %cst = arith.constant dense<0.000000e+00> : vector<32x64xf32>
    %2 = tpu.matmul %0, %1, %cst {dimension_numbers = #tpu.dot_dimension_numbers<[1], [0], [0], [1], [0, 0, 1, 1], [], []>} : vector<32x33xbf16>, vector<33x64xbf16>, vector<32x64xf32> -> vector<32x64xf32>
    %c0_3 = arith.constant 0 : index
    %c0_4 = arith.constant 0 : index
    %3 = vector.load %arg3[%c0_3, %c0_4] : memref<1x64xf32, #tpu.memory_space<vmem>>, vector<1x64xf32>
    %4 = vector.broadcast %3 : vector<1x64xf32> to vector<32x64xf32>
    %5 = arith.addf %2, %4 : vector<32x64xf32>
    %cst_5 = arith.constant 0.000000e+00 : f32
    %6 = vector.broadcast %cst_5 : f32 to vector<32x64xf32>
    %7 = arith.maximumf %5, %6 : vector<32x64xf32>
    %8 = arith.truncf %7 : vector<32x64xf32> to vector<32x64xbf16>
    %c0_6 = arith.constant 0 : index
    %c0_7 = arith.constant 0 : index
    %9 = vector.load %arg4[%c0_6, %c0_7] : memref<64x16xbf16, #tpu.memory_space<vmem>>, vector<64x16xbf16>
    %cst_8 = arith.constant dense<0.000000e+00> : vector<32x16xf32>
    %10 = tpu.matmul %8, %9, %cst_8 {dimension_numbers = #tpu.dot_dimension_numbers<[1], [0], [0], [1], [0, 0, 1, 1], [], []>} : vector<32x64xbf16>, vector<64x16xbf16>, vector<32x16xf32> -> vector<32x16xf32>
    %c0_9 = arith.constant 0 : index
    %c0_10 = arith.constant 0 : index
    %11 = vector.load %arg5[%c0_9, %c0_10] : memref<1x16xf32, #tpu.memory_space<vmem>>, vector<1x16xf32>
    %12 = vector.broadcast %11 : vector<1x16xf32> to vector<32x16xf32>
    %13 = arith.addf %10, %12 : vector<32x16xf32>
    %14 = arith.truncf %13 : vector<32x16xf32> to vector<32x16xbf16>
    %c0_11 = arith.constant 0 : index
    %c0_12 = arith.constant 0 : index
    %15 = vector.load %arg6[%c0_11, %c0_12] : memref<32x16xbf16, #tpu.memory_space<vmem>>, vector<32x16xbf16>
    tpu.vector_store %arg6[%c0_11, %c0_12], %14 {strides = array<i32>} : memref<32x16xbf16, #tpu.memory_space<vmem>>, vector<32x16xbf16>,
    return
  }
  func.func @transform_0(%arg0: i32) -> (i32, i32) {
    %c0_i32 = arith.constant 0 : i32
    %c0_i32_0 = arith.constant 0 : i32
    return %arg0, %c0_i32 : i32, i32
  }
  func.func @transform_1(%arg0: i32) -> (i32, i32) {
    %c0_i32 = arith.constant 0 : i32
    %c0_i32_0 = arith.constant 0 : i32
    %c0_i32_1 = arith.constant 0 : i32
    return %c0_i32, %c0_i32_0 : i32, i32
  }
  func.func @transform_2(%arg0: i32) -> (i32, i32) {
    %c0_i32 = arith.constant 0 : i32
    %c0_i32_0 = arith.constant 0 : i32
    %c0_i32_1 = arith.constant 0 : i32
    return %c0_i32, %c0_i32_0 : i32, i32
  }
  func.func @transform_3(%arg0: i32) -> (i32, i32) {
    %c0_i32 = arith.constant 0 : i32
    %c0_i32_0 = arith.constant 0 : i32
    %c0_i32_1 = arith.constant 0 : i32
    return %c0_i32, %c0_i32_0 : i32, i32
  }
  func.func @transform_4(%arg0: i32) -> (i32, i32) {
    %c0_i32 = arith.constant 0 : i32
    %c0_i32_0 = arith.constant 0 : i32
    %c0_i32_1 = arith.constant 0 : i32
    return %c0_i32, %c0_i32_0 : i32, i32
  }
  func.func @transform_5(%arg0: i32) -> (i32, i32) {
    %c0_i32 = arith.constant 0 : i32
    %c0_i32_0 = arith.constant 0 : i32
    return %arg0, %c0_i32 : i32, i32
  }
}

</mosaic_0001>

<bundles_post_ra>
// kernel: tpu_custom_call.1
= control target key start
LH: loop header
LB: loop body
LE: loop exit
PB: predicated region body
PF: predicated region fallthrough
CT: control target
= control target key end

     0   :  { %s634_s18 = smov 0   ;;  %s685_s0 = inlined_call_operand.vmem [shape: bf16[64,33], index: 0, kind: input, shape index: {}]   ;;  %s686_s1 = inlined_call_operand.vmem [shape: bf16[33,64], index: 1, kind: input, shape index: {}]   ;;  %s687_s2 = inlined_call_operand.vmem [shape: f32[1,64], index: 2, kind: input, shape index: {}]   ;;  %s688_s3 = inlined_call_operand.vmem [shape: bf16[64,16], index: 3, kind: input, shape index: {}]   ;;  %s689_s4 = inlined_call_operand.vmem [shape: f32[1,16], index: 4, kind: input, shape index: {}]   ;;  %s690_s5 = inlined_call_operand.vmem [shape: bf16[64,16], index: 5, kind: output, shape index: {}]  }
   0x1 LB: > { %s510_s19 = sadd.s32 4294967295, %s601_s18   ;;  %p514_p0 = scmp.ge.s32.totalorder %s601_s18, 1  ;;  %s601_s18 = sphi %s634_s18, %s15_s18  }
   0x2   : > { %p188_p1 = scmp.lt.s32.totalorder %s601_s18, 3 }
   0x4   : > { %p189_p2 = pnand %p514_p0, %p188_p1 }
   0x5   : > { %v586_v0 = vld [vmem:[%s686_s1] sm:$0xff] (!%p189_p2)   ;;  %vm277_vm0 = vcmask (!%p189_p2), 1040384   ;;  %v587_v1 = vld [vmem:[%s686_s1 + $0x8] sm:$0xff] (!%p189_p2)   ;;  %v588_v2 = vld [vmem:[%s686_s1 + $0x10] ss:$0 sps:$4 sm:$0x11] (!%p189_p2)  }
   0x6   : > { %192 = sbr.rel (%p189_p2) target bundleno = 460 (0x1cc), region = 40  ;;  %555 = vmatprep.subr.bf16.mxu0 (!%p189_p2), %v586_v0  ;;  %v603_v3 = vmov (!%p189_p2), 0   ;;  %s515_s26 = sshll.u32 (!%p189_p2), %s510_s19, 2  ;;  %v591_v6 = vld [vmem:[%s688_s3] sm:$0xff] (!%p189_p2)   ;;  %v592_v7 = vld [vmem:[%s688_s3 + $0x8] sm:$0xff] (!%p189_p2)   ;;  %vm270_vm1 = vcmask (!%p189_p2), 269312  }
   0x7   : > { %v279_v4 = vsel (!%p189_p2), %vm277_vm0, 65535, %v603_v3  ;;  %556 = vmatpush3.bf16.msra.mxu0 (!%p189_p2), %v586_v0  ;;  %p217_p3 = scmp.lt.s32.totalorder (!%p189_p2), %s515_s26, 7  ;;  %565 = vmatprep.subr.bf16.mxu1 (!%p189_p2), %v591_v6  ;;  %v593_v10 = vld [vmem:[%s688_s3 + $0x10] sm:$0xff] (!%p189_p2)   ;;  %v594_v11 = vld [vmem:[%s688_s3 + $0x18] sm:$0xff] (!%p189_p2)   ;;  %v519_v12 = vld [vmem:[%s687_s2] ss:$0 sm:$0xff] (!%p189_p2) }
   0x8   : > { %557 = vmatprep.subr.bf16.mxu0 (!%p189_p2), %v587_v1  ;;  %v281_v5 = vand.u32 (!%p189_p2), %v588_v2, %v279_v4  ;;  %566 = vmatpush3.bf16.msra.mxu1 (!%p189_p2), %v591_v6  ;;  %vm377_vm2 = vcmask (!%p189_p2), 523264   ;;  %v527_v27 = vld [vmem:[%s689_s4] ss:$0 sm:$0xff] (!%p189_p2)  ;;  %vm449_vm3 = vcmask (!%p189_p2), 125952  }
   0x9   : > { %567 = vmatprep.subr.bf16.mxu1 (!%p189_p2), %v592_v7 }
   0xb   : > { %558 = vmatpush3.bf16.msra.mxu0 (!%p189_p2), %v587_v1 }
   0xc   : > { %559 = vmatprep.subr.bf16.mxu0 (!%p189_p2), %v281_v5  ;;  %568 = vmatpush3.bf16.msra.mxu1 (!%p189_p2), %v592_v7 }
   0xd   : > { %s692_s26 = smov (!%p217_p3, %s515_s26), 7  ;;  %569 = vmatprep.subr.bf16.mxu1 %v593_v10 }
   0xe   : > { %s516_s6 = sshll.u32 %s692_s26, 2 }
   0xf   : > { %s220_s9 = scalar_lea.vmem %s685_s0, %s516_s6  ;;  %560 = vmatpush3.bf16.msra.mxu0 %v281_v5  ;;  %s226_s21 = scalar_lea.vmem %s690_s5, %s516_s6 }
  0x10   : > { %v589_v8 = vld [vmem:[%s220_s9] sm:$0xff]   ;;  %v590_v9 = vld [vmem:[%s220_s9 + $0x8] sm:$0xff]   ;;  %570 = vmatpush3.bf16.msra.mxu1 %v593_v10 }
  0x11   : > { %561 = vmatprep.mubr.msk.bf16.mxu0 %vm270_vm1, %v589_v8  ;;  %571 = vmatprep.subr.bf16.mxu1 %v594_v11 }
  0x12   : > { %562 = vmatmul.mubr.msk.bf16.vlgmr.msra.gmra.mrb[0].mxu0 %vm270_vm1, %v590_v9 }
  0x14   : > { %572 = vmatpush3.bf16.msra.mxu1 %v594_v11 }
  0xe5   : > { %v563_v13 = vpop.f32.mrb[0].mxu0 }
  0xe6   : > { %v326_v14 = vadd.f32 %v563_v13, %v519_v12  ;;  %v317_v15 = vpop.f32.mrb[1].mxu0 }
  0xe7   : > { %v318_v16 = vadd.f32 %v519_v12, %v317_v15  ;;  %v564_v17 = vpop.f32.mrb[2].mxu0 }
  0xe8   : > { %v329_v18 = vadd.f32 %v564_v17, %v519_v12  ;;  %v320_v19 = vpop.f32.mrb[3].mxu0  ;;  %v334_v21 = vmax.f32 %v326_v14, 0.0 }
  0xe9   : > { %v321_v20 = vadd.f32 %v519_v12, %v320_v19  ;;  %v332_v23 = vmax.f32 %v318_v16, 0.0 }
  0xea   : > { %v335_v22 = vmax.f32 %v329_v18, 0.0 }
  0xeb   : > { %v333_v24 = vmax.f32 %v321_v20, 0.0 }
  0xec   : > { %v337_v25 = vpack.c.bf16 %v335_v22, %v334_v21 }
  0xed   : > { %v336_v26 = vpack.c.bf16 %v333_v24, %v332_v23 }
  0xef   : > { %573 = vmatprep.mubr.msk.bf16.mxu1 %vm377_vm2, %v336_v26 }
  0xf0   : > { %574 = vmatmul.mubr.msk.bf16.vlgmr.msra.gmra.mrb[0].mxu1 %vm377_vm2, %v337_v25 }
 0x1c3   : > { %v575_v28 = vpop.f32.mrb[0].mxu1 }
 0x1c4   : > { %v418_v29 = vpop.f32.mrb[1].mxu1  ;;  %v427_v32 = vadd.f32 %v575_v28, %v527_v27 }
 0x1c5   : > { %v419_v30 = vadd.f32 %v527_v27, %v418_v29  ;;  %v576_v31 = vpop.f32.mrb[2].mxu1 }
 0x1c6   : > { %v421_v33 = vpop.f32.mrb[3].mxu1  ;;  %v430_v35 = vadd.f32 %v576_v31, %v527_v27  ;;  %v542_v38 = vpack.c.bf16 %v427_v32, %v427_v32 }
 0x1c7   : > { %v540_v34 = vpack.c.bf16 %v419_v30, %v419_v30  ;;  %v422_v36 = vadd.f32 %v527_v27, %v421_v33 }
 0x1c8   : > { %v543_v39 = vpack.c.bf16 %v430_v35, %v430_v35  ;;  %452 = vst.msk [vmem:[%s226_s21 + $0x8] sm:$0xf] %vm449_vm3, %v542_v38 }
 0x1c9   : > { %450 = vst.msk [vmem:[%s226_s21] sm:$0xf] %vm449_vm3, %v540_v34  ;;  %v541_v37 = vpack.c.bf16 %v422_v36, %v422_v36 }
 0x1ca   : > { %453 = vst.msk [vmem:[%s226_s21 + $0xc] sm:$0xf] %vm449_vm3, %v543_v39 }
 0x1cb   : > { %451 = vst.msk [vmem:[%s226_s21 + $0x4] sm:$0xf] %vm449_vm3, %v541_v37 }
 0x1cc PF: > { %s15_s18 = sadd.s32 1, %s601_s18  }
 0x1cd   : > { %p12_p4 = scmp.ge.s32.totalorder %s15_s18, 4  }
 0x1cf   :  { %14 = sbr.rel (!%p12_p4) target bundleno = 1 (0x1), region = 70 }

</bundles_post_ra>
